<compile_context>
chip_gen: v6e
topology: v6e:2x2x1
jax: 0.10.0
libtpu: 0.0.40
codegen_flags: <defaults>
</compile_context>

<pallas_src>
import jax
import jax.numpy as jnp
from jax.experimental import pallas as pl
from jax.experimental.pallas import tpu as pltpu

LANE = 128      # TPU lane width (last-dim tile)
SUBLANE = 8     # f32 sublane tile (second-to-last dim); x stays f32 in HBM


def _round_up(n, m):
    return ((n + m - 1) // m) * m


def value_network_kernel(x_ref, w1_ref, w2_ref, bvec_ref, bh_ref, out_ref):
    """One batch tile.
    x_ref:   (TB, IN)    f32   (unpadded feature dim)
    w1_ref:  (IN, H_P)   bf16
    w2_ref:  (H_P, H_P)  bf16
    bvec_ref:(3, H_P)    f32   rows = [b1, b2, wh]
    bh_ref:  (1, 1)      f32   SMEM scalar (head bias)
    out_ref: (1, TB)     f32   lane-dense value row
    """
    b1 = bvec_ref[0:1, :]
    b2 = bvec_ref[1:2, :]
    wh = bvec_ref[2:3, :]

    x = x_ref[...].astype(w1_ref.dtype)                                  # cast right before the dot
    h1 = jnp.dot(x, w1_ref[...], preferred_element_type=jnp.float32) + b1
    h1 = jnp.maximum(h1, 0.0).astype(w2_ref.dtype)                       # ReLU in f32, cast for MXU
    h2 = jnp.dot(h1, w2_ref[...], preferred_element_type=jnp.float32) + b2
    h2 = jnp.maximum(h2, 0.0)                                            # (TB, H_P) f32

    # Value head: contract the H_P axis of (1, H_P) x (TB, H_P) -> (1, TB).
    # Result is already lane-dense (batch along lanes), so the store is unmasked.
    v = jax.lax.dot_general(wh, h2, (((1,), (1,)), ((), ())),
                            preferred_element_type=jnp.float32)
    out_ref[...] = v + bh_ref[0, 0]


def init_params(key, in_features, hidden):
    """PyTorch nn.Linear default init (U[-1/sqrt(fan_in), 1/sqrt(fan_in)]).
    Weights stored as (in_features, out_features) (transposed vs torch)."""
    def linear(k, fan_in, fan_out):
        kw, kb = jax.random.split(k)
        bound = 1.0 / jnp.sqrt(jnp.float32(fan_in))
        w = jax.random.uniform(kw, (fan_in, fan_out), jnp.float32, -bound, bound)
        b = jax.random.uniform(kb, (1, fan_out), jnp.float32, -bound, bound)
        return w, b

    k1, k2, k3 = jax.random.split(key, 3)
    w1, b1 = linear(k1, in_features, hidden)   # body layer 0
    w2, b2 = linear(k2, hidden, hidden)        # body layer 1 (layers[-2])
    wh, bh = linear(k3, hidden, 1)             # value head -> scalar per sample
    return {"w1": w1, "b1": b1, "w2": w2, "b2": b2, "wh": wh, "bh": bh}


def prepare_params(params, compute_dtype=jnp.bfloat16):
    """One-time: zero-pad the HIDDEN dim to the 128-lane tile, cast MXU weights
    to bf16, pack b1/b2/wh into one (3, H_P) f32 block.  The input feature dim
    of w1 is left unpadded (x is fed unpadded)."""
    in_f, hidden = params["w1"].shape
    hid_p = _round_up(hidden, LANE)

    def pad_cols(a):
        return jnp.pad(a, ((0, 0), (0, hid_p - a.shape[1])))

    w1 = pad_cols(params["w1"]).astype(compute_dtype)                        # (IN, H_P)
    w2 = jnp.pad(params["w2"],
                 ((0, hid_p - hidden), (0, hid_p - hidden))).astype(compute_dtype)  # (H_P, H_P)
    bvec = jnp.concatenate(
        [pad_cols(params["b1"]), pad_cols(params["b2"]), pad_cols(params["wh"].T)],
        axis=0)                                                              # (3, H_P) f32
    bh = params["bh"].reshape(1, 1)                                          # (1, 1) f32
    return {"w1": w1, "w2": w2, "bvec": bvec, "bh": bh}


def value_network_forward(x, pp, *, block_b=2048):
    """x: (B, IN) float32. pp: prepare_params(...) output. Returns (B, 1) f32."""
    B, in_f = x.shape
    hid_p = pp["w2"].shape[0]

    # Tile choice: small batches -> a single grid step (per-step overhead ~0.35 us
    # dwarfs the tiny DMA).  Large batches -> lane-aligned tiles (multiple of 128
    # so the (1, tb) output block stays unmasked) with a >=2-tile target so the
    # "parallel" axis can shard across TCs on v7x.
    b8 = _round_up(B, SUBLANE)
    if b8 <= min(block_b, 1024):
        tb = b8
    else:
        tb = min(_round_up(block_b, LANE), _round_up(pl.cdiv(B, 2), LANE))
    b_pad = _round_up(B, tb)
    xp = x if b_pad == B else jnp.pad(x, ((0, b_pad - B), (0, 0)))

    grid = (b_pad // tb,)
    const = lambda i: (0, 0)  # weights / biases resident across all batch tiles

    hidden_real = hid_p  # padded lanes are zero; use padded sizes as an upper bound
    flops = 2 * B * (in_f * hidden_real + hidden_real * hidden_real + hidden_real)
    bytes_accessed = (xp.size * xp.dtype.itemsize
                      + pp["w1"].size * pp["w1"].dtype.itemsize
                      + pp["w2"].size * pp["w2"].dtype.itemsize
                      + pp["bvec"].size * 4 + 4
                      + b_pad * 4)

    out = pl.pallas_call(
        value_network_kernel,
        out_shape=jax.ShapeDtypeStruct((1, b_pad), jnp.float32),
        grid=grid,
        in_specs=[
            pl.BlockSpec((tb, in_f), lambda i: (i, 0)),          # x tile (pipelined, unpadded lanes)
            pl.BlockSpec((in_f, hid_p), const),                  # w1 (resident)
            pl.BlockSpec((hid_p, hid_p), const),                 # w2 (resident)
            pl.BlockSpec((3, hid_p), const),                     # [b1; b2; wh] (resident)
            pl.BlockSpec(memory_space=pltpu.MemorySpace.SMEM),   # bh scalar
        ],
        out_specs=pl.BlockSpec((1, tb), lambda i: (0, i)),        # lane-dense output row
        compiler_params=pltpu.CompilerParams(
            dimension_semantics=("parallel",),                    # megacore sharding on v7x
        ),
        cost_estimate=pl.CostEstimate(flops=flops, transcendentals=0,
                                      bytes_accessed=bytes_accessed),
    )(xp, pp["w1"], pp["w2"], pp["bvec"], pp["bh"])

    # (1, b_pad) row -> (B, 1) column; padded batch rows are dropped here.
    return out.reshape(b_pad, 1)[:B]


def reference_forward(x, p, compute_dtype=jnp.bfloat16):
    """Pure-JAX reference mirroring the kernel's bf16-operand / f32-acc math."""
    h1 = jnp.maximum(
        jnp.dot(x.astype(compute_dtype), p["w1"].astype(compute_dtype),
                preferred_element_type=jnp.float32) + p["b1"], 0.0)
    h2 = jnp.maximum(
        jnp.dot(h1.astype(compute_dtype), p["w2"].astype(compute_dtype),
                preferred_element_type=jnp.float32) + p["b2"], 0.0)
    return jnp.dot(h2, p["wh"]) + p["bh"]


if __name__ == "__main__":
    B, IN, HIDDEN = 64, 16, 32
    key = jax.random.PRNGKey(0)
    kx, kp, kx2 = jax.random.split(key, 3)

    params = init_params(kp, IN, HIDDEN)
    pp = prepare_params(params, compute_dtype=jnp.bfloat16)

    # Small batch: single-tile path (one grid step, no batch padding).
    x = jax.random.normal(kx, (B, IN), jnp.float32)
    out = jax.block_until_ready(value_network_forward(x, pp))
    ref = reference_forward(x, params)
    assert out.shape == (B, 1)
    assert jnp.allclose(out, ref, atol=5e-3, rtol=5e-3), float(jnp.max(jnp.abs(out - ref)))

    # Larger ragged batch with a small block_b: multi-tile, lane-aligned (grid=3) path.
    B2 = 300
    x2 = jax.random.normal(kx2, (B2, IN), jnp.float32)
    out2 = jax.block_until_ready(value_network_forward(x2, pp, block_b=128))
    ref2 = reference_forward(x2, params)
    assert out2.shape == (B2, 1)
    assert jnp.allclose(out2, ref2, atol=5e-3, rtol=5e-3), float(jnp.max(jnp.abs(out2 - ref2)))

    print("KERNEL_OK")
</pallas_src>

<mosaic_0001>
module attributes {stable_mosaic.version = 11 : i64} {
  func.func @value_network_kernel(%arg0: i32, %arg1: memref<64x16xf32, #tpu.memory_space<vmem>>, %arg2: memref<16x128xbf16, #tpu.memory_space<vmem>>, %arg3: memref<128x128xbf16, #tpu.memory_space<vmem>>, %arg4: memref<3x128xf32, #tpu.memory_space<vmem>>, %arg5: memref<1x1xf32, #tpu.memory_space<smem>>, %arg6: memref<1x64xf32, #tpu.memory_space<vmem>>) attributes {dimension_semantics = [#tpu.dimension_semantics<parallel>], iteration_bounds = array<i64: 1>, scalar_prefetch = 0 : i64, scratch_operands = 0 : i64, tpu.core_type = #tpu.core_type<tc>, window_params = [{transform_indices = @transform_0, window_bounds = array<i64: 64, 16>}, {pipeline_mode = #tpu.pipeline_mode<synchronous>, transform_indices = @transform_1, window_bounds = array<i64: 16, 128>}, {pipeline_mode = #tpu.pipeline_mode<synchronous>, transform_indices = @transform_2, window_bounds = array<i64: 128, 128>}, {pipeline_mode = #tpu.pipeline_mode<synchronous>, transform_indices = @transform_3, window_bounds = array<i64: 3, 128>}, {transform_indices = @transform_4, window_bounds = array<i64: 1, 1>}, {transform_indices = @transform_5, window_bounds = array<i64: 1, 64>}]} {
    %c0 = arith.constant 0 : index
    %c0_0 = arith.constant 0 : index
    %0 = vector.load %arg4[%c0, %c0_0] : memref<3x128xf32, #tpu.memory_space<vmem>>, vector<1x128xf32>
    %c1 = arith.constant 1 : index
    %c0_1 = arith.constant 0 : index
    %1 = vector.load %arg4[%c1, %c0_1] : memref<3x128xf32, #tpu.memory_space<vmem>>, vector<1x128xf32>
    %c2 = arith.constant 2 : index
    %c0_2 = arith.constant 0 : index
    %2 = vector.load %arg4[%c2, %c0_2] : memref<3x128xf32, #tpu.memory_space<vmem>>, vector<1x128xf32>
    %c0_3 = arith.constant 0 : index
    %c0_4 = arith.constant 0 : index
    %3 = vector.load %arg1[%c0_3, %c0_4] : memref<64x16xf32, #tpu.memory_space<vmem>>, vector<64x16xf32>
    %4 = arith.truncf %3 : vector<64x16xf32> to vector<64x16xbf16>
    %c0_5 = arith.constant 0 : index
    %c0_6 = arith.constant 0 : index
    %5 = vector.load %arg2[%c0_5, %c0_6] : memref<16x128xbf16, #tpu.memory_space<vmem>>, vector<16x128xbf16>
    %cst = arith.constant dense<0.000000e+00> : vector<64x128xf32>
    %6 = tpu.matmul %4, %5, %cst {dimension_numbers = #tpu.dot_dimension_numbers<[1], [0], [0], [1], [0, 0, 1, 1], [], []>} : vector<64x16xbf16>, vector<16x128xbf16>, vector<64x128xf32> -> vector<64x128xf32>
    %7 = vector.broadcast %0 : vector<1x128xf32> to vector<64x128xf32>
    %8 = arith.addf %6, %7 : vector<64x128xf32>
    %cst_7 = arith.constant 0.000000e+00 : f32
    %9 = vector.broadcast %cst_7 : f32 to vector<64x128xf32>
    %10 = arith.maximumf %8, %9 : vector<64x128xf32>
    %11 = arith.truncf %10 : vector<64x128xf32> to vector<64x128xbf16>
    %c0_8 = arith.constant 0 : index
    %c0_9 = arith.constant 0 : index
    %12 = vector.load %arg3[%c0_8, %c0_9] : memref<128x128xbf16, #tpu.memory_space<vmem>>, vector<128x128xbf16>
    %cst_10 = arith.constant dense<0.000000e+00> : vector<64x128xf32>
    %13 = tpu.matmul %11, %12, %cst_10 {dimension_numbers = #tpu.dot_dimension_numbers<[1], [0], [0], [1], [0, 0, 1, 1], [], []>} : vector<64x128xbf16>, vector<128x128xbf16>, vector<64x128xf32> -> vector<64x128xf32>
    %14 = vector.broadcast %1 : vector<1x128xf32> to vector<64x128xf32>
    %15 = arith.addf %13, %14 : vector<64x128xf32>
    %cst_11 = arith.constant 0.000000e+00 : f32
    %16 = vector.broadcast %cst_11 : f32 to vector<64x128xf32>
    %17 = arith.maximumf %15, %16 : vector<64x128xf32>
    %cst_12 = arith.constant dense<0.000000e+00> : vector<1x64xf32>
    %18 = tpu.matmul %2, %17, %cst_12 {dimension_numbers = #tpu.dot_dimension_numbers<[1], [1], [0], [0], [0, 0, 1, 0], [], []>} : vector<1x128xf32>, vector<64x128xf32>, vector<1x64xf32> -> vector<1x64xf32>
    %c0_13 = arith.constant 0 : index
    %c0_14 = arith.constant 0 : index
    %19 = memref.load %arg5[%c0_13, %c0_14] : memref<1x1xf32, #tpu.memory_space<smem>>
    %20 = vector.broadcast %19 : f32 to vector<1x64xf32>
    %21 = arith.addf %18, %20 : vector<1x64xf32>
    %c0_15 = arith.constant 0 : index
    %c0_16 = arith.constant 0 : index
    %22 = vector.load %arg6[%c0_15, %c0_16] : memref<1x64xf32, #tpu.memory_space<vmem>>, vector<1x64xf32>
    tpu.vector_store %arg6[%c0_15, %c0_16], %21 {strides = array<i32>} : memref<1x64xf32, #tpu.memory_space<vmem>>, vector<1x64xf32>,
    return
  }
  func.func @transform_0(%arg0: i32) -> (i32, i32) {
    %c0_i32 = arith.constant 0 : i32
    %c0_i32_0 = arith.constant 0 : i32
    return %arg0, %c0_i32 : i32, i32
  }
  func.func @transform_1(%arg0: i32) -> (i32, i32) {
    %c0_i32 = arith.constant 0 : i32
    %c0_i32_0 = arith.constant 0 : i32
    %c0_i32_1 = arith.constant 0 : i32
    return %c0_i32, %c0_i32_0 : i32, i32
  }
  func.func @transform_2(%arg0: i32) -> (i32, i32) {
    %c0_i32 = arith.constant 0 : i32
    %c0_i32_0 = arith.constant 0 : i32
    %c0_i32_1 = arith.constant 0 : i32
    return %c0_i32, %c0_i32_0 : i32, i32
  }
  func.func @transform_3(%arg0: i32) -> (i32, i32) {
    %c0_i32 = arith.constant 0 : i32
    %c0_i32_0 = arith.constant 0 : i32
    %c0_i32_1 = arith.constant 0 : i32
    return %c0_i32, %c0_i32_0 : i32, i32
  }
  func.func @transform_4(%arg0: i32) -> (i32, i32) {
    %c0_i32 = arith.constant 0 : i32
    %c0_i32_0 = arith.constant 0 : i32
    %c0_i32_1 = arith.constant 0 : i32
    return %c0_i32, %c0_i32_0 : i32, i32
  }
  func.func @transform_5(%arg0: i32) -> (i32, i32) {
    %c0_i32 = arith.constant 0 : i32
    %c0_i32_0 = arith.constant 0 : i32
    return %c0_i32, %arg0 : i32, i32
  }
}

</mosaic_0001>

<bundles_post_ra>
// kernel: tpu_custom_call.1
= control target key start
LH: loop header
LB: loop body
LE: loop exit
PB: predicated region body
PF: predicated region fallthrough
CT: control target
= control target key end

     0   :  { %vm50_vm0 = vcmask 130048   ;;  %s600_s0 = inlined_call_operand.vmem [shape: f32[64,16], index: 0, kind: input, shape index: {}]   ;;  %s601_s1 = inlined_call_operand.vmem [shape: bf16[16,128], index: 1, kind: input, shape index: {}]   ;;  %s602_s2 = inlined_call_operand.vmem [shape: bf16[128,128], index: 2, kind: input, shape index: {}]   ;;  %s603_s3 = inlined_call_operand.vmem [shape: f32[3,128], index: 3, kind: input, shape index: {}]   ;;  %s604_s4 = inlined_call_operand.<no memory space> [shape: f32[1,1], index: 4, kind: input, shape index: {}]   ;;  %s605_s5 = inlined_call_operand.hbm [shape: f32[1,64], index: 5, kind: output, shape index: {}]  }
   0x1   :  { %v466_v0 = vld [vmem:[%s601_s1] sm:$0xff]   ;;  %v27_v2 = vld [vmem:[%s600_s0 + $0x8] sm:$0xff]  ;;  %v28_v3 = vld [vmem:[%s600_s0 + $0x10] sm:$0xff] }
   0x2   :  { %v26_v1 = vld [vmem:[%s600_s0] sm:$0xff]  ;;  %410 = vmatprep.subr.bf16.mxu0 %v466_v0  ;;  %v29_v5 = vld [vmem:[%s600_s0 + $0x18] sm:$0xff]  ;;  %v31_v7 = vld [vmem:[%s600_s0 + $0x28] sm:$0xff] }
   0x3   :  { %v34_v4 = vpack.c.bf16 %v27_v2, %v26_v1  ;;  %v30_v6 = vld [vmem:[%s600_s0 + $0x20] sm:$0xff]  ;;  %411 = vmatpush3.bf16.msra.mxu0 %v466_v0  ;;  %v35_v8 = vpack.c.bf16 %v29_v5, %v28_v3  ;;  %v467_v10 = vld [vmem:[%s602_s2 + $0x38] sm:$0xff]   ;;  %v468_v11 = vld [vmem:[%s602_s2 + $0x30] sm:$0xff]  }
   0x4   :  { %v36_v9 = vpack.c.bf16 %v31_v7, %v30_v6  ;;  %v32_v12 = vld [vmem:[%s600_s0 + $0x30] sm:$0xff]  ;;  %420 = vmatprep.subr.bf16.mxu1 %v467_v10  ;;  %v33_v13 = vld [vmem:[%s600_s0 + $0x38] sm:$0xff]  ;;  %v469_v14 = vld [vmem:[%s602_s2 + $0x28] sm:$0xff]  }
   0x5   :  { %412 = vmatprep.mubr.msk.bf16.mxu0 %vm50_vm0, %v34_v4  ;;  %421 = vmatpush3.bf16.msra.mxu1 %v467_v10  ;;  %v37_v15 = vpack.c.bf16 %v33_v13, %v32_v12 }
   0x6   :  { %413 = vmatmul.mubr.msk.bf16.vlgmr.msra.gmra.mxu0 %vm50_vm0, %v35_v8  ;;  %422 = vmatprep.subr.bf16.mxu1 %v468_v11 }
   0x7   :  { %416 = vmatprep.mubr.msk.bf16.mxu0 %vm50_vm0, %v36_v9 }
   0x8   :  { %11 = vsyncpa [#allocation4], 0  ;;  %v470_v16 = vld [vmem:[%s602_s2 + $0x20] sm:$0xff]   ;;  %v471_v17 = vld [vmem:[%s602_s2 + $0x18] sm:$0xff]   ;;  %v497_v50 = vmov 0.0   ;;  %vm498_vm1 = vmmov 0   ;;  %v282_v13 = vstv %s604_s4 }
   0x9   :  { %423 = vmatpush3.bf16.msra.mxu1 %v468_v11  ;;  %v472_v18 = vld [vmem:[%s602_s2 + $0x10] sm:$0xff]   ;;  %v473_v19 = vld [vmem:[%s602_s2 + $0x8] sm:$0xff]   ;;  %v474_v20 = vld [vmem:[%s602_s2] sm:$0xff]   ;;  %444 = vmatprep.subr.mxu0 %v497_v50  ;;  %s499_s6 = smov [#allocation3]   ;;  %vm353_vm2 = vcmask 516096  }
   0xa   :  { %424 = vmatprep.subr.bf16.mxu1 %v469_v14  ;;  %v369_v23 = vld [vmem:[%s603_s3] ss:$0 sm:$0xff]  ;;  %v375_v57 = vld [vmem:[%s603_s3 + $0x1] ss:$0 sm:$0xff]  ;;  %v25_v12 = vld [vmem:[%s603_s3 + $0x2] sm:$0x1] }
   0xb   :  { %s361_s7 = sshll.u32 %s499_s6, 4  ;;  %s362_s7 = int_to_ptr.vmem [resolvable:$true] %s361_s7 }
   0xc   :  { %s475_s8 = scalar_lea.vmem %s362_s7, 16  ;;  %s479_s9 = scalar_lea.vmem %s362_s7, 32 }
   0xd   :  { %425 = vmatpush3.bf16.msra.mxu1 %v469_v14  ;;  %p476_p0 = scmp.ne.s32.totalorder %s362_s7, %s475_s8  ;;  %p480_p1 = scmp.lt.s32.totalorder %s362_s7, %s362_s7 }
   0xe   :  { %417 = vmatmul.mubr.msk.bf16.gmra.mxu0 %vm50_vm0, %v37_v15  ;;  %426 = vmatprep.subr.bf16.mxu1 %v470_v16  ;;  %p481_p2 = scmp.lt.s32.totalorder %s479_s9, %s475_s8 }
   0xf   :  { %460 = vmatprep.mubr.msk.f32.mxu0 %vm498_vm1, %v497_v50 }
  0x10   :  { %p482_p3 = por %p481_p2, %p480_p1 }
  0x11   :  { %427 = vmatpush3.bf16.msra.mxu1 %v470_v16 }
  0x12   :  { %428 = vmatprep.subr.bf16.mxu1 %v471_v17  ;;  %p483_p4 = pnand %p482_p3, %p476_p0 }
  0x15   :  { %429 = vmatpush3.bf16.msra.mxu1 %v471_v17 }
  0x16   :  { %430 = vmatprep.subr.bf16.mxu1 %v472_v18 }
  0x19   :  { %431 = vmatpush3.bf16.msra.mxu1 %v472_v18 }
  0x1a   :  { %432 = vmatprep.subr.bf16.mxu1 %v473_v19 }
  0x1d   :  { %433 = vmatpush3.bf16.msra.mxu1 %v473_v19 }
  0x1e   :  { %434 = vmatprep.subr.bf16.mxu1 %v474_v20 }
  0x21   :  { %435 = vmatpush3.bf16.msra.mxu1 %v474_v20 }
  0xc6   :  { %v414_v21 = vpop.f32.mrf.mxu0 }
  0xc7   :  { %v106_v27 = vadd.f32 %v414_v21, %v369_v23 }
  0xc8   :  { %v97_v22 = vpop.f32.mrf.mxu0 }
  0xc9   :  { %v98_v25 = vadd.f32 %v369_v23, %v97_v22  ;;  %v130_v34 = vmax.f32 %v106_v27, 0.0 }
  0xca   :  { %v415_v24 = vpop.f32.mrf.mxu0 }
  0xcb   :  { %v109_v26 = vadd.f32 %v415_v24, %v369_v23  ;;  %v128_v32 = vmax.f32 %v98_v25, 0.0 }
  0xcc   :  { %v100_v28 = vpop.f32.mrf.mxu0 }
  0xcd   :  { %v101_v29 = vadd.f32 %v369_v23, %v100_v28  ;;  %v131_v30 = vmax.f32 %v109_v26, 0.0 }
  0xce   :  { %v418_v31 = vpop.f32.mrf.mxu0 }
  0xcf   :  { %v129_v33 = vmax.f32 %v101_v29, 0.0  ;;  %v137_v37 = vpack.c.bf16 %v131_v30, %v130_v34  ;;  %v122_v41 = vadd.f32 %v418_v31, %v369_v23 }
  0xd0   :  { %v113_v35 = vpop.f32.mrf.mxu0 }
  0xd1   :  { %v136_v36 = vpack.c.bf16 %v129_v33, %v128_v32  ;;  %v114_v39 = vadd.f32 %v369_v23, %v113_v35  ;;  %v134_v47 = vmax.f32 %v122_v41, 0.0 }
  0xd2   :  { %v419_v38 = vpop.f32.mrf.mxu0 }
  0xd3   :  { %v125_v40 = vadd.f32 %v419_v38, %v369_v23  ;;  %436 = vmatprep.mubr.bf16.mxu1 %v136_v36  ;;  %v132_v45 = vmax.f32 %v114_v39, 0.0 }
  0xd4   :  { %v116_v42 = vpop.f32.mrf.mxu0  ;;  %437 = vmatmul.mubr.bf16.vlgmr.msra.gmra.mxu1 %v137_v37 }
  0xd5   :  { %v117_v43 = vadd.f32 %v369_v23, %v116_v42  ;;  %v135_v44 = vmax.f32 %v125_v40, 0.0 }
  0xd7   :  { %v133_v46 = vmax.f32 %v117_v43, 0.0  ;;  %v139_v49 = vpack.c.bf16 %v135_v44, %v134_v47 }
  0xd9   :  { %v138_v48 = vpack.c.bf16 %v133_v46, %v132_v45 }
  0xdb   :  { %440 = vmatprep.mubr.bf16.mxu1 %v138_v48 }
  0xdc   :  { %441 = vmatmul.mubr.bf16.gmra.mxu1 %v139_v49 }
 0x194   :  { %v438_v51 = vpop.f32.mrf.mxu1 }
 0x195   :  { %v251_v5 = vadd.f32 %v438_v51, %v375_v57 }
 0x196   :  { %v242_v52 = vpop.f32.mrf.mxu1 }
 0x197   :  { %v275_v7 = vmax.f32 %v251_v5, 0.0  ;;  %v243_v9 = vadd.f32 %v375_v57, %v242_v52 }
 0x198   :  { %v439_v53 = vpop.f32.mrf.mxu1 }
 0x199   :  { %v254_v3 = vadd.f32 %v439_v53, %v375_v57  ;;  %v273_v11 = vmax.f32 %v243_v9, 0.0 }
 0x19a   :  { %v245_v54 = vpop.f32.mrf.mxu1 }
 0x19b   :  { %v276_v6 = vmax.f32 %v254_v3, 0.0  ;;  %v246_v8 = vadd.f32 %v375_v57, %v245_v54 }
 0x19c   :  { %v442_v55 = vpop.f32.mrf.mxu1 }
 0x19d   :  { %v267_v60 = vadd.f32 %v442_v55, %v375_v57  ;;  %v274_v10 = vmax.f32 %v246_v8, 0.0 }
 0x19e   :  { %v258_v56 = vpop.f32.mrf.mxu1 }
 0x19f   :  { %v279_v63 = vmax.f32 %v267_v60, 0.0  ;;  %v259_v1 = vadd.f32 %v375_v57, %v258_v56 }
 0x1a0   :  { %v443_v58 = vpop.f32.mrf.mxu1 }
 0x1a1   :  { %v270_v59 = vadd.f32 %v443_v58, %v375_v57  ;;  %v277_v4 = vmax.f32 %v259_v1, 0.0 }
 0x1a2   :  { %v261_v62 = vpop.f32.mrf.mxu1 }
 0x1a3   :  { %v280_v61 = vmax.f32 %v270_v59, 0.0  ;;  %v262_v0 = vadd.f32 %v375_v57, %v261_v62 }
 0x1a5   :  { %445 = vmatpush3.xpose.msra.mxu0 %v280_v61  ;;  %v278_v2 = vmax.f32 %v262_v0, 0.0 }
 0x1a6   :  { %446 = vmatprep.subr.mxu0 %v497_v50 }
 0x1a9   :  { %447 = vmatpush3.xpose.msra.mxu0 %v279_v63 }
 0x1aa   :  { %448 = vmatprep.subr.mxu0 %v497_v50 }
 0x1ad   :  { %449 = vmatpush3.xpose.msra.mxu0 %v278_v2 }
 0x1ae   :  { %450 = vmatprep.subr.mxu0 %v497_v50 }
 0x1b1   :  { %451 = vmatpush3.xpose.msra.mxu0 %v277_v4 }
 0x1b2   :  { %452 = vmatprep.subr.mxu0 %v497_v50 }
 0x1b5   :  { %453 = vmatpush3.xpose.msra.mxu0 %v276_v6 }
 0x1b6   :  { %454 = vmatprep.subr.mxu0 %v497_v50 }
 0x1b9   :  { %455 = vmatpush3.xpose.msra.mxu0 %v275_v7 }
 0x1ba   :  { %456 = vmatprep.subr.mxu0 %v497_v50 }
 0x1bd   :  { %457 = vmatpush3.xpose.msra.mxu0 %v274_v10 }
 0x1be   :  { %458 = vmatprep.subr.mxu0 %v497_v50 }
 0x1c1   :  { %459 = vmatpush3.xpose.msra.mxu0 %v273_v11 }
 0x1c4   :  { %461 = vmatmul.mubr.f32.vlgmr.msra.gmra.mxu0 %v25_v12 }
 0x284   :  { %v349_v14 = vpop.f32.mrf.mxu0 }
 0x285   :  { %v350_v15 = vadd.f32 %v349_v14, %v282_v13 }
 0x286   :  { %v462_v16 = vpop.f32.mrf.mxu0 }
 0x287   :  { %354 = vst.msk [vmem:[#allocation3] sm:$0x1] %vm353_vm2, %v350_v15 }
 0x288   :  { %486 = shalt.err (!%p483_p4)
}
 0x289   :  { %364 = dma.vmem_to_hbm [thread:$0]  %s362_s7, 16, %s605_s5, [#allocation4]  }
 0x28a   :  { %495 = dma.done.wait [#allocation4], 16  }
 0x28b   :  { %496 = vsyncadd [#allocation4], 4294967280 }
 0x28c   :  { %368 = vsyncpa [#allocation4], 1 }

</bundles_post_ra>
